<compile_context>
chip_gen: v7x
topology: tpu7x:2x2x1
jax: 0.10.0
libtpu: 0.0.40
codegen_flags: <defaults>
</compile_context>

<pallas_src>
import functools

import jax
import jax.numpy as jnp
from jax.experimental import pallas as pl
from jax.experimental.pallas import tpu as pltpu  # noqa: F401  (TPU backend)

_BN_EPS = 1e-5
_LANE = 128  # pad all feature dims to multiples of the vreg lane width


# -----------------------------------------------------------------------------
# Helpers
# -----------------------------------------------------------------------------
def _pad_to(n, m):
    return ((n + m - 1) // m) * m


def _pad2d(a, rows, cols):
    """Zero-pad a 2-D array up to (rows, cols)."""
    out = jnp.zeros((rows, cols), a.dtype)
    return out.at[: a.shape[0], : a.shape[1]].set(a)


def _full_spec(shape):
    # Tiny problem: no grid, whole array as a single VMEM block.
    return pl.BlockSpec(shape, lambda: (0,) * len(shape))


# -----------------------------------------------------------------------------
# Fused MLP kernel (generated per static config)
# -----------------------------------------------------------------------------
def _make_fused_mlp_kernel(num_hidden, batch_norm):
    """Kernel args: x_ref, *layer_params..., o_ref.

    Per hidden layer the params are (Wt, gamma, beta) when batch_norm else
    (Wt, b); the trailing two params are the final (Wf, bf). All weights are
    pre-transposed to [in_pad, out_pad] and zero-padded; biases / BN params are
    [1, out_pad]. Zero-padded feature columns stay exactly zero through
    BN (var=0 -> scale finite, data 0) and ReLU, so padding never leaks.
    """

    def kernel(*refs):
        x_ref, o_ref = refs[0], refs[-1]
        params = refs[1:-1]
        z = x_ref[...]
        i = 0
        for _ in range(num_hidden):
            if batch_norm:
                wt, g, b = params[i], params[i + 1], params[i + 2]
                i += 3
                # Linear bias omitted: cancelled exactly by the batch-mean
                # subtraction of training-mode BN.
                h = jnp.dot(z, wt[...], preferred_element_type=jnp.float32)
                mean = jnp.mean(h, axis=0, keepdims=True)          # XLU
                var = jnp.mean(h * h, axis=0, keepdims=True) - mean * mean
                scale = g[...] * jax.lax.rsqrt(var + _BN_EPS)      # EUP rsqrt
                shift = b[...] - mean * scale
                z = jnp.maximum(h * scale + shift, 0.0)            # 2 VPU ops + max
            else:
                wt, b = params[i], params[i + 1]
                i += 2
                h = jnp.dot(z, wt[...], preferred_element_type=jnp.float32) + b[...]
                z = jnp.maximum(h, 0.0)
        wf, bf = params[i], params[i + 1]
        o_ref[...] = (
            jnp.dot(z, wf[...], preferred_element_type=jnp.float32) + bf[...]
        ).astype(o_ref.dtype)

    return kernel


@functools.partial(jax.jit, static_argnames=("num_hidden", "batch_norm", "z_dim"))
def _tab_encoder_forward(x, params, *, num_hidden, batch_norm, z_dim):
    B, x_dim = x.shape
    in_pad = params[0].shape[0]     # padded input dim of first layer
    out_pad = params[-1].shape[1]   # padded z_dim
    # Lane-pad the input; stays fused under jit with the pallas_call.
    x_pad = jnp.zeros((B, in_pad), jnp.float32).at[:, :x_dim].set(x)

    kernel = _make_fused_mlp_kernel(num_hidden, batch_norm)
    args = (x_pad,) + tuple(params)
    out = pl.pallas_call(
        kernel,
        out_shape=jax.ShapeDtypeStruct((B, out_pad), jnp.float32),
        in_specs=[_full_spec(a.shape) for a in args],
        out_specs=_full_spec((B, out_pad)),
    )(*args)
    return out[:, :z_dim]


# -----------------------------------------------------------------------------
# TabEncoder wrapper (parameter construction matches nn.Linear / BatchNorm1d init)
# -----------------------------------------------------------------------------
class TabEncoderPallas:
    def __init__(self, x_dim, h_dim, z_dim, bias, num_layers, batch_norm, key):
        self.batch_norm = batch_norm
        self.z_dim = z_dim
        self.num_hidden = num_layers - 1

        params = []
        in_dim = x_dim
        in_pad = _pad_to(x_dim, _LANE)
        for _ in range(self.num_hidden):
            out_pad = _pad_to(h_dim, _LANE)
            key, kw, kb = jax.random.split(key, 3)
            bound = 1.0 / float(in_dim) ** 0.5
            W = jax.random.uniform(kw, (h_dim, in_dim), jnp.float32, -bound, bound)
            Wt = _pad2d(W.T, in_pad, out_pad)                      # [in_pad, out_pad]
            if batch_norm:
                # BN affine init (weight=1, bias=0); identity when affine=False too.
                gamma = _pad2d(jnp.ones((1, h_dim), jnp.float32), 1, out_pad)
                beta = _pad2d(jnp.zeros((1, h_dim), jnp.float32), 1, out_pad)
                params += [Wt, gamma, beta]    # linear bias dropped (cancelled by BN)
            else:
                b = (jax.random.uniform(kb, (h_dim,), jnp.float32, -bound, bound)
                     if bias else jnp.zeros((h_dim,), jnp.float32))
                params += [Wt, _pad2d(b.reshape(1, h_dim), 1, out_pad)]
            in_dim, in_pad = h_dim, out_pad

        # Final fc.
        key, kw, kb = jax.random.split(key, 3)
        bound = 1.0 / float(in_dim) ** 0.5
        Wf = jax.random.uniform(kw, (z_dim, in_dim), jnp.float32, -bound, bound)
        bf = (jax.random.uniform(kb, (z_dim,), jnp.float32, -bound, bound)
              if bias else jnp.zeros((z_dim,), jnp.float32))
        z_pad = _pad_to(z_dim, _LANE)
        params += [_pad2d(Wf.T, in_pad, z_pad),
                   _pad2d(bf.reshape(1, z_dim), 1, z_pad)]
        self.params = tuple(params)

    def __call__(self, x):
        # Batch maps to the sublane axis; a multiple of 8 (f32) gives dense sublane
        # traffic. Any B is numerically correct (BN stats use the true batch only).
        return _tab_encoder_forward(
            x, self.params,
            num_hidden=self.num_hidden,
            batch_norm=self.batch_norm,
            z_dim=self.z_dim,
        )


# -----------------------------------------------------------------------------
if __name__ == "__main__":
    key = jax.random.PRNGKey(0)
    k_x, k_p = jax.random.split(key)

    batch, x_dim, h_dim, z_dim = 8, 16, 32, 8
    num_layers, bias, batch_norm = 3, True, True

    x = jax.random.normal(k_x, (batch, x_dim), jnp.float32)

    model = TabEncoderPallas(x_dim, h_dim, z_dim, bias, num_layers, batch_norm, k_p)
    z = model(x)
    jax.block_until_ready(z)
    assert z.shape == (batch, z_dim), z.shape

    # Pure-JAX reference (same training-mode BN semantics) as a sanity check.
    def ref_forward(xv):
        p = model.params
        zz = xv
        in_dim, i = x_dim, 0
        for _ in range(num_layers - 1):
            Wt = p[i][:in_dim, :h_dim]
            g, be = p[i + 1][:, :h_dim], p[i + 2][:, :h_dim]
            i += 3
            h = zz @ Wt  # bias before training-mode BN is a no-op
            mean = h.mean(0, keepdims=True)
            var = ((h - mean) ** 2).mean(0, keepdims=True)
            zz = jnp.maximum((h - mean) * jax.lax.rsqrt(var + _BN_EPS) * g + be, 0.0)
            in_dim = h_dim
        Wf, bf = p[i][:in_dim, :z_dim], p[i + 1][:, :z_dim]
        return zz @ Wf + bf

    z_ref = ref_forward(x)
    assert bool(jnp.all(jnp.isfinite(z)))
    assert bool(jnp.max(jnp.abs(z - z_ref)) < 1e-2), float(jnp.max(jnp.abs(z - z_ref)))
    print("KERNEL_OK")
</pallas_src>

<mosaic_0001>
module attributes {stable_mosaic.version = 11 : i64} {
  func.func @kernel(%arg0: memref<8x128xf32, #tpu.memory_space<vmem>>, %arg1: memref<128x128xf32, #tpu.memory_space<vmem>>, %arg2: memref<1x128xf32, #tpu.memory_space<vmem>>, %arg3: memref<1x128xf32, #tpu.memory_space<vmem>>, %arg4: memref<128x128xf32, #tpu.memory_space<vmem>>, %arg5: memref<1x128xf32, #tpu.memory_space<vmem>>, %arg6: memref<1x128xf32, #tpu.memory_space<vmem>>, %arg7: memref<128x128xf32, #tpu.memory_space<vmem>>, %arg8: memref<1x128xf32, #tpu.memory_space<vmem>>, %arg9: memref<8x128xf32, #tpu.memory_space<vmem>>) attributes {dimension_semantics = [], scalar_prefetch = 0 : i64, scratch_operands = 0 : i64, tpu.core_type = #tpu.core_type<tc>} {
    %c0 = arith.constant 0 : index
    %c0_0 = arith.constant 0 : index
    %0 = vector.load %arg0[%c0, %c0_0] : memref<8x128xf32, #tpu.memory_space<vmem>>, vector<8x128xf32>
    %c0_1 = arith.constant 0 : index
    %c0_2 = arith.constant 0 : index
    %1 = vector.load %arg1[%c0_1, %c0_2] : memref<128x128xf32, #tpu.memory_space<vmem>>, vector<128x128xf32>
    %cst = arith.constant dense<0.000000e+00> : vector<8x128xf32>
    %2 = tpu.matmul %0, %1, %cst {dimension_numbers = #tpu.dot_dimension_numbers<[1], [0], [0], [1], [0, 0, 1, 1], [], []>} : vector<8x128xf32>, vector<128x128xf32>, vector<8x128xf32> -> vector<8x128xf32>
    %cst_3 = arith.constant dense<0.000000e+00> : vector<128xf32>
    %3 = vector.multi_reduction <add>, %2, %cst_3 [0] : vector<8x128xf32> to vector<128xf32>
    %4 = vector.shape_cast %3 : vector<128xf32> to vector<1x128xf32>
    %cst_4 = arith.constant 8.000000e+00 : f32
    %5 = vector.broadcast %cst_4 : f32 to vector<1x128xf32>
    %6 = arith.divf %4, %5 : vector<1x128xf32>
    %7 = arith.mulf %2, %2 : vector<8x128xf32>
    %cst_5 = arith.constant dense<0.000000e+00> : vector<128xf32>
    %8 = vector.multi_reduction <add>, %7, %cst_5 [0] : vector<8x128xf32> to vector<128xf32>
    %9 = vector.shape_cast %8 : vector<128xf32> to vector<1x128xf32>
    %cst_6 = arith.constant 8.000000e+00 : f32
    %10 = vector.broadcast %cst_6 : f32 to vector<1x128xf32>
    %11 = arith.divf %9, %10 : vector<1x128xf32>
    %12 = arith.mulf %6, %6 : vector<1x128xf32>
    %13 = arith.subf %11, %12 : vector<1x128xf32>
    %c0_7 = arith.constant 0 : index
    %c0_8 = arith.constant 0 : index
    %14 = vector.load %arg2[%c0_7, %c0_8] : memref<1x128xf32, #tpu.memory_space<vmem>>, vector<1x128xf32>
    %cst_9 = arith.constant 9.99999974E-6 : f32
    %15 = vector.broadcast %cst_9 : f32 to vector<1x128xf32>
    %16 = arith.addf %13, %15 : vector<1x128xf32>
    %17 = math.rsqrt %16 : vector<1x128xf32>
    %18 = arith.mulf %14, %17 : vector<1x128xf32>
    %c0_10 = arith.constant 0 : index
    %c0_11 = arith.constant 0 : index
    %19 = vector.load %arg3[%c0_10, %c0_11] : memref<1x128xf32, #tpu.memory_space<vmem>>, vector<1x128xf32>
    %20 = arith.mulf %6, %18 : vector<1x128xf32>
    %21 = arith.subf %19, %20 : vector<1x128xf32>
    %22 = vector.broadcast %18 : vector<1x128xf32> to vector<8x128xf32>
    %23 = arith.mulf %2, %22 : vector<8x128xf32>
    %24 = vector.broadcast %21 : vector<1x128xf32> to vector<8x128xf32>
    %25 = arith.addf %23, %24 : vector<8x128xf32>
    %cst_12 = arith.constant 0.000000e+00 : f32
    %26 = vector.broadcast %cst_12 : f32 to vector<8x128xf32>
    %27 = arith.maximumf %25, %26 : vector<8x128xf32>
    %c0_13 = arith.constant 0 : index
    %c0_14 = arith.constant 0 : index
    %28 = vector.load %arg4[%c0_13, %c0_14] : memref<128x128xf32, #tpu.memory_space<vmem>>, vector<128x128xf32>
    %cst_15 = arith.constant dense<0.000000e+00> : vector<8x128xf32>
    %29 = tpu.matmul %27, %28, %cst_15 {dimension_numbers = #tpu.dot_dimension_numbers<[1], [0], [0], [1], [0, 0, 1, 1], [], []>} : vector<8x128xf32>, vector<128x128xf32>, vector<8x128xf32> -> vector<8x128xf32>
    %cst_16 = arith.constant dense<0.000000e+00> : vector<128xf32>
    %30 = vector.multi_reduction <add>, %29, %cst_16 [0] : vector<8x128xf32> to vector<128xf32>
    %31 = vector.shape_cast %30 : vector<128xf32> to vector<1x128xf32>
    %cst_17 = arith.constant 8.000000e+00 : f32
    %32 = vector.broadcast %cst_17 : f32 to vector<1x128xf32>
    %33 = arith.divf %31, %32 : vector<1x128xf32>
    %34 = arith.mulf %29, %29 : vector<8x128xf32>
    %cst_18 = arith.constant dense<0.000000e+00> : vector<128xf32>
    %35 = vector.multi_reduction <add>, %34, %cst_18 [0] : vector<8x128xf32> to vector<128xf32>
    %36 = vector.shape_cast %35 : vector<128xf32> to vector<1x128xf32>
    %cst_19 = arith.constant 8.000000e+00 : f32
    %37 = vector.broadcast %cst_19 : f32 to vector<1x128xf32>
    %38 = arith.divf %36, %37 : vector<1x128xf32>
    %39 = arith.mulf %33, %33 : vector<1x128xf32>
    %40 = arith.subf %38, %39 : vector<1x128xf32>
    %c0_20 = arith.constant 0 : index
    %c0_21 = arith.constant 0 : index
    %41 = vector.load %arg5[%c0_20, %c0_21] : memref<1x128xf32, #tpu.memory_space<vmem>>, vector<1x128xf32>
    %cst_22 = arith.constant 9.99999974E-6 : f32
    %42 = vector.broadcast %cst_22 : f32 to vector<1x128xf32>
    %43 = arith.addf %40, %42 : vector<1x128xf32>
    %44 = math.rsqrt %43 : vector<1x128xf32>
    %45 = arith.mulf %41, %44 : vector<1x128xf32>
    %c0_23 = arith.constant 0 : index
    %c0_24 = arith.constant 0 : index
    %46 = vector.load %arg6[%c0_23, %c0_24] : memref<1x128xf32, #tpu.memory_space<vmem>>, vector<1x128xf32>
    %47 = arith.mulf %33, %45 : vector<1x128xf32>
    %48 = arith.subf %46, %47 : vector<1x128xf32>
    %49 = vector.broadcast %45 : vector<1x128xf32> to vector<8x128xf32>
    %50 = arith.mulf %29, %49 : vector<8x128xf32>
    %51 = vector.broadcast %48 : vector<1x128xf32> to vector<8x128xf32>
    %52 = arith.addf %50, %51 : vector<8x128xf32>
    %cst_25 = arith.constant 0.000000e+00 : f32
    %53 = vector.broadcast %cst_25 : f32 to vector<8x128xf32>
    %54 = arith.maximumf %52, %53 : vector<8x128xf32>
    %c0_26 = arith.constant 0 : index
    %c0_27 = arith.constant 0 : index
    %55 = vector.load %arg7[%c0_26, %c0_27] : memref<128x128xf32, #tpu.memory_space<vmem>>, vector<128x128xf32>
    %cst_28 = arith.constant dense<0.000000e+00> : vector<8x128xf32>
    %56 = tpu.matmul %54, %55, %cst_28 {dimension_numbers = #tpu.dot_dimension_numbers<[1], [0], [0], [1], [0, 0, 1, 1], [], []>} : vector<8x128xf32>, vector<128x128xf32>, vector<8x128xf32> -> vector<8x128xf32>
    %c0_29 = arith.constant 0 : index
    %c0_30 = arith.constant 0 : index
    %57 = vector.load %arg8[%c0_29, %c0_30] : memref<1x128xf32, #tpu.memory_space<vmem>>, vector<1x128xf32>
    %58 = vector.broadcast %57 : vector<1x128xf32> to vector<8x128xf32>
    %59 = arith.addf %56, %58 : vector<8x128xf32>
    %c0_31 = arith.constant 0 : index
    %c0_32 = arith.constant 0 : index
    %60 = vector.load %arg9[%c0_31, %c0_32] : memref<8x128xf32, #tpu.memory_space<vmem>>, vector<8x128xf32>
    tpu.vector_store %arg9[%c0_31, %c0_32], %59 {strides = array<i32>} : memref<8x128xf32, #tpu.memory_space<vmem>>, vector<8x128xf32>,
    return
  }
}

</mosaic_0001>

<bundles_post_ra>
// kernel: _tab_encoder_forward.1
= control target key start
LH: loop header
LB: loop body
LE: loop exit
PB: predicated region body
PF: predicated region fallthrough
CT: control target
= control target key end

     0   :  { %14 = vsyncpa [#allocation3], 0  ;;  %s946_s0 = inlined_call_operand.vmem [shape: f32[8,128], index: 0, kind: input, shape index: {}]   ;;  %s947_s1 = inlined_call_operand.hbm [shape: f32[128,128], index: 1, kind: input, shape index: {}]   ;;  %s948_s2 = inlined_call_operand.vmem [shape: f32[1,128], index: 2, kind: input, shape index: {}]   ;;  %s949_s3 = inlined_call_operand.vmem [shape: f32[1,128], index: 3, kind: input, shape index: {}]   ;;  %s950_s4 = inlined_call_operand.hbm [shape: f32[128,128], index: 4, kind: input, shape index: {}]   ;;  %s951_s5 = inlined_call_operand.vmem [shape: f32[1,128], index: 5, kind: input, shape index: {}]   ;;  %s952_s6 = inlined_call_operand.vmem [shape: f32[1,128], index: 6, kind: input, shape index: {}]   ;;  %s953_s7 = inlined_call_operand.hbm [shape: f32[128,128], index: 7, kind: input, shape index: {}]   ;;  %s954_s8 = inlined_call_operand.vmem [shape: f32[1,128], index: 8, kind: input, shape index: {}]   ;;  %s955_s9 = inlined_call_operand.hbm [shape: f32[8,128], index: 9, kind: output, shape index: {}]  }
   0x1   :  { %15 = vsyncpa [#allocation6], 0 }
   0x2   :  { %16 = vsyncpa [#allocation4], 0  ;;  %s772_s30 = smov [#allocation5]   ;;  %s773_s11 = smov [#allocation2]  }
   0x3   :  { %s40_s10 = sshll.u32 %s772_s30, 4  ;;  %s24_s12 = sshll.u32 %s773_s11, 4  ;;  %s41_s10 = int_to_ptr.vmem [resolvable:$true] %s40_s10  ;;  %s831_s12 = int_to_ptr.vmem [resolvable:$true] %s24_s12 }
   0x4   :  { %s678_s15 = scalar_lea.hbm %s950_s4, 2048 }
   0x5   :  { %p679_p0 = scmp.ne.s32.totalorder %s950_s4, %s678_s15  ;;  %p682_p1 = scmp.lt.u32.totalorder %s678_s15, %s950_s4 }
   0x7   :  { %p684_p2 = pnand %p682_p1, %p679_p0 }
   0x9   :  { %687 = shalt.err (!%p684_p2)
}
   0xa   :  { %s688_s20 = scalar_lea.vmem %s41_s10, 2048  ;;  %p693_p4 = scmp.lt.s32.totalorder %s41_s10, %s41_s10 }
   0xb   :  { %p689_p3 = scmp.ne.s32.totalorder %s41_s10, %s688_s20  ;;  %p694_p5 = scmp.lt.s32.totalorder %s688_s20, %s688_s20 }
   0xd   :  { %p695_p6 = por %p694_p5, %p693_p4 }
   0xf   :  { %p696_p7 = pnand %p695_p6, %p689_p3 }
  0x11   :  { %699 = shalt.err (!%p696_p7)
}
  0x12   :  { %s774_s21 = smov 128   ;;  %s775_s22 = smov 8  }
  0x13   :  { %46 = dma.hbm_to_vmem [thread:$0]  %s950_s4, 2048, %s41_s10, [#allocation6], %s774_s21, %s774_s21, %s775_s22  }
  0x14   :  { %s700_s27 = scalar_lea.hbm %s947_s1, 2048 }
  0x15   :  { %p701_p8 = scmp.ne.s32.totalorder %s947_s1, %s700_s27  ;;  %p704_p9 = scmp.lt.u32.totalorder %s700_s27, %s947_s1 }
  0x17   :  { %p706_p10 = pnand %p704_p9, %p701_p8 }
  0x19   :  { %709 = shalt.err (!%p706_p10)
}
  0x1a   :  { %s710_s13 = scalar_lea.vmem %s831_s12, 2048  ;;  %p715_p12 = scmp.lt.s32.totalorder %s831_s12, %s831_s12 }
  0x1b   :  { %p711_p11 = scmp.ne.s32.totalorder %s831_s12, %s710_s13  ;;  %p716_p13 = scmp.lt.s32.totalorder %s710_s13, %s710_s13 }
  0x1d   :  { %p717_p0 = por %p716_p13, %p715_p12 }
  0x1f   :  { %p718_p1 = pnand %p717_p0, %p711_p11 }
  0x21   :  { %721 = shalt.err (!%p718_p1)
}
  0x22   :  { %30 = dma.hbm_to_vmem [thread:$0]  %s947_s1, 2048, %s831_s12, [#allocation3], %s774_s21, %s774_s21, %s775_s22  }
  0x23   :  { %s776_s14 = smov [#allocation7]   ;;  %s722_s18 = scalar_lea.hbm %s953_s7, 2048 }
  0x24   :  { %s56_s15 = sshll.u32 %s776_s14, 4  ;;  %p723_p2 = scmp.ne.s32.totalorder %s953_s7, %s722_s18  ;;  %s57_s15 = int_to_ptr.vmem [resolvable:$true] %s56_s15 }
  0x25   :  { %p726_p3 = scmp.lt.u32.totalorder %s722_s18, %s953_s7 }
  0x27   :  { %p728_p4 = pnand %p726_p3, %p723_p2 }
  0x29   :  { %731 = shalt.err (!%p728_p4)
}
  0x2a   :  { %s732_s25 = scalar_lea.vmem %s57_s15, 2048  ;;  %p737_p6 = scmp.lt.s32.totalorder %s57_s15, %s57_s15 }
  0x2b   :  { %p733_p5 = scmp.ne.s32.totalorder %s57_s15, %s732_s25  ;;  %p738_p7 = scmp.lt.s32.totalorder %s732_s25, %s732_s25 }
  0x2d   :  { %p739_p8 = por %p738_p7, %p737_p6 }
  0x2f   :  { %p740_p9 = pnand %p739_p8, %p733_p5 }
  0x31   :  { %743 = shalt.err (!%p740_p9)
}
  0x32   :  { %62 = dma.hbm_to_vmem [thread:$0]  %s953_s7, 2048, %s57_s15, [#allocation6], %s774_s21, %s774_s21, %s775_s22  }
  0x33   :  { %766 = dma.done.wait [#allocation3], 2048  }
  0x34   :  { %767 = vsyncadd [#allocation3], 4294965248 }
  0x35   :  { %768 = dma.done.wait [#allocation6], 4096  }
  0x36   :  { %769 = vsyncadd [#allocation6], 4294963200  ;;  %v777_v0 = vmov 0.0|0.0   ;;  %vm778_vm0 = vmmov 0   ;;  %v779_v1 = vmov 0.0   ;;  %v75_v2 = vld [vmem:[#allocation2] sm:$0xff] }
  0x37   :  { %593 = vmatprep.subr.bf16.mxu0 %v777_v0  ;;  %520 = vmatprep.mubr.msk.f32.mxu0 %vm778_vm0, %v779_v1  ;;  %v76_v3 = vld [vmem:[#allocation2 + $0x8] sm:$0xff]  ;;  %v77_v4 = vld [vmem:[#allocation2 + $0x10] sm:$0xff]  ;;  %v78_v6 = vld [vmem:[#allocation2 + $0x18] sm:$0xff] }
  0x38   :  { %617 = vmatprep.subr.bf16.mxu1 %v777_v0  ;;  %555 = vmatprep.mubr.msk.f32.mxu1 %vm778_vm0, %v779_v1  ;;  %v594_v5 = vpack.c.bf16 %v76_v3, %v75_v2  ;;  %v597_v7 = vpack.c.bf16 %v78_v6, %v77_v4  ;;  %v79_v8 = vld [vmem:[#allocation2 + $0x20] sm:$0xff]  ;;  %v80_v9 = vld [vmem:[#allocation2 + $0x28] sm:$0xff]  ;;  %v81_v11 = vld [vmem:[#allocation2 + $0x30] sm:$0xff] }
  0x39   :  { %v600_v10 = vpack.c.bf16 %v80_v9, %v79_v8  ;;  %v82_v12 = vld [vmem:[#allocation2 + $0x38] sm:$0xff]  ;;  %v83_v14 = vld [vmem:[#allocation2 + $0x40] sm:$0xff]  ;;  %v84_v15 = vld [vmem:[#allocation2 + $0x48] sm:$0xff]  ;;  %v187_v8 = vlaneseq }
  0x3a   :  { %595 = vmatpush3.bf16.msra.mxu0 %v594_v5  ;;  %v603_v13 = vpack.c.bf16 %v82_v12, %v81_v11  ;;  %v606_v16 = vpack.c.bf16 %v84_v15, %v83_v14  ;;  %v85_v17 = vld [vmem:[#allocation2 + $0x50] sm:$0xff]  ;;  %v86_v18 = vld [vmem:[#allocation2 + $0x58] sm:$0xff]  ;;  %v87_v20 = vld [vmem:[#allocation2 + $0x60] sm:$0xff] }
  0x3b   :  { %596 = vmatprep.subr.bf16.mxu0 %v777_v0  ;;  %v609_v19 = vpack.c.bf16 %v86_v18, %v85_v17  ;;  %v88_v21 = vld [vmem:[#allocation2 + $0x68] sm:$0xff]  ;;  %v89_v23 = vld [vmem:[#allocation2 + $0x70] sm:$0xff]  ;;  %v90_v24 = vld [vmem:[#allocation2 + $0x78] sm:$0xff]  ;;  %v188_v9 = vshrl.u32 %v187_v8, 7 }
  0x3c   :  { %v612_v22 = vpack.c.bf16 %v88_v21, %v87_v20  ;;  %v615_v25 = vpack.c.bf16 %v90_v24, %v89_v23  ;;  %v74_v26 = vld [vmem:[%s946_s0] sm:$0xff]  ;;  %v202_v28 = vld [vmem:[#allocation5 + $0x8] sm:$0xff]  ;;  %v203_v30 = vld [vmem:[#allocation5 + $0x10] sm:$0xff] }
  0x3d   :  { %v201_v27 = vld [vmem:[#allocation5] sm:$0xff]  ;;  %v204_v31 = vld [vmem:[#allocation5 + $0x18] sm:$0xff]  ;;  %v206_v34 = vld [vmem:[#allocation5 + $0x28] sm:$0xff]  ;;  %v909_v11 = vsub.s32 0, %v188_v9 }
  0x3e   :  { %598 = vmatpush3.bf16.msra.mxu0 %v597_v7  ;;  %v618_v29 = vpack.c.bf16 %v202_v28, %v201_v27  ;;  %v621_v32 = vpack.c.bf16 %v204_v31, %v203_v30  ;;  %v205_v33 = vld [vmem:[#allocation5 + $0x20] sm:$0xff]  ;;  %v207_v36 = vld [vmem:[#allocation5 + $0x30] sm:$0xff]  ;;  %v208_v37 = vld [vmem:[#allocation5 + $0x38] sm:$0xff] }
  0x3f   :  { %599 = vmatprep.subr.bf16.mxu0 %v777_v0  ;;  %v624_v35 = vpack.c.bf16 %v206_v34, %v205_v33  ;;  %v627_v38 = vpack.c.bf16 %v208_v37, %v207_v36  ;;  %v209_v39 = vld [vmem:[#allocation5 + $0x40] sm:$0xff]  ;;  %v210_v40 = vld [vmem:[#allocation5 + $0x48] sm:$0xff]  ;;  %v211_v42 = vld [vmem:[#allocation5 + $0x50] sm:$0xff] }
  0x40   :  { %619 = vmatpush3.bf16.msra.mxu1 %v618_v29  ;;  %v630_v41 = vpack.c.bf16 %v210_v40, %v209_v39  ;;  %v212_v43 = vld [vmem:[#allocation5 + $0x58] sm:$0xff]  ;;  %v213_v45 = vld [vmem:[#allocation5 + $0x60] sm:$0xff]  ;;  %v214_v46 = vld [vmem:[#allocation5 + $0x68] sm:$0xff] }
  0x41   :  { %620 = vmatprep.subr.bf16.mxu1 %v777_v0  ;;  %v633_v44 = vpack.c.bf16 %v212_v43, %v211_v42  ;;  %v636_v47 = vpack.c.bf16 %v214_v46, %v213_v45  ;;  %v215_v48 = vld [vmem:[#allocation5 + $0x70] sm:$0xff]  ;;  %v216_v49 = vld [vmem:[#allocation5 + $0x78] sm:$0xff]  ;;  %v183_v14 = vld [vmem:[%s949_s3] sm:$0x1] }
  0x42   :  { %601 = vmatpush3.bf16.msra.mxu0 %v600_v10  ;;  %v639_v50 = vpack.c.bf16 %v216_v49, %v215_v48  ;;  %v179_v10 = vld [vmem:[%s948_s2] sm:$0x1]  ;;  %v327_v23 = vld [vmem:[#allocation7 + $0x8] sm:$0xff]  ;;  %v332_v31 = vld [vmem:[#allocation7 + $0x30] sm:$0xff] }
  0x43   :  { %602 = vmatprep.subr.bf16.mxu0 %v777_v0  ;;  %v330_v28 = vld [vmem:[#allocation7 + $0x20] sm:$0xff]  ;;  %v331_v29 = vld [vmem:[#allocation7 + $0x28] sm:$0xff]  ;;  %v336_v37 = vld [vmem:[#allocation7 + $0x50] sm:$0xff] }
  0x44   :  { %622 = vmatpush3.bf16.msra.mxu1 %v621_v32  ;;  %v648_v30 = vpack.c.bf16 %v331_v29, %v330_v28  ;;  %v333_v32 = vld [vmem:[#allocation7 + $0x38] sm:$0xff]  ;;  %v334_v34 = vld [vmem:[#allocation7 + $0x40] sm:$0xff]  ;;  %v340_v43 = vld [vmem:[#allocation7 + $0x70] sm:$0xff] }
  0x45   :  { %623 = vmatprep.subr.bf16.mxu1 %v777_v0  ;;  %v651_v33 = vpack.c.bf16 %v333_v32, %v332_v31  ;;  %v338_v40 = vld [vmem:[#allocation7 + $0x60] sm:$0xff] }
  0x46   :  { %604 = vmatpush3.bf16.msra.mxu0 %v603_v13 }
  0x47   :  { %605 = vmatprep.subr.bf16.mxu0 %v777_v0 }
  0x48   :  { %625 = vmatpush3.bf16.msra.mxu1 %v624_v35  ;;  %v335_v35 = vld [vmem:[#allocation7 + $0x48] sm:$0xff] }
  0x49   :  { %626 = vmatprep.subr.bf16.mxu1 %v777_v0  ;;  %v654_v36 = vpack.c.bf16 %v335_v35, %v334_v34 }
  0x4a   :  { %607 = vmatpush3.bf16.msra.mxu0 %v606_v16 }
  0x4b   :  { %608 = vmatprep.subr.bf16.mxu0 %v777_v0 }
  0x4c   :  { %628 = vmatpush3.bf16.msra.mxu1 %v627_v38  ;;  %v337_v38 = vld [vmem:[#allocation7 + $0x58] sm:$0xff] }
  0x4d   :  { %629 = vmatprep.subr.bf16.mxu1 %v777_v0  ;;  %v657_v39 = vpack.c.bf16 %v337_v38, %v336_v37 }
  0x4e   :  { %610 = vmatpush3.bf16.msra.mxu0 %v609_v19 }
  0x4f   :  { %611 = vmatprep.subr.bf16.mxu0 %v777_v0 }
  0x50   :  { %631 = vmatpush3.bf16.msra.mxu1 %v630_v41  ;;  %v339_v41 = vld [vmem:[#allocation7 + $0x68] sm:$0xff] }
  0x51   :  { %632 = vmatprep.subr.bf16.mxu1 %v777_v0  ;;  %v660_v42 = vpack.c.bf16 %v339_v41, %v338_v40 }
  0x52   :  { %613 = vmatpush3.bf16.msra.mxu0 %v612_v22  ;;  %v326_v22 = vld [vmem:[#allocation7] sm:$0xff] }
  0x53   :  { %614 = vmatprep.subr.bf16.mxu0 %v777_v0  ;;  %v642_v24 = vpack.c.bf16 %v327_v23, %v326_v22 }
  0x54   :  { %634 = vmatpush3.bf16.msra.mxu1 %v633_v44  ;;  %v341_v44 = vld [vmem:[#allocation7 + $0x78] sm:$0xff] }
  0x55   :  { %635 = vmatprep.subr.bf16.mxu1 %v777_v0  ;;  %v663_v45 = vpack.c.bf16 %v341_v44, %v340_v43 }
  0x56   :  { %616 = vmatpush3.bf16.msra.mxu0 %v615_v25  ;;  %v328_v25 = vld [vmem:[#allocation7 + $0x10] sm:$0xff] }
  0x57   :  { %641 = vmatprep.subr.bf16.mxu0 %v777_v0 }
  0x58   :  { %637 = vmatpush3.bf16.msra.mxu1 %v636_v47 }
  0x59   :  { %521 = vmatmul.mubr.f32.vlgmr.msra.gmra.mrb[0].mxu0 %v74_v26  ;;  %638 = vmatprep.subr.bf16.mxu1 %v777_v0  ;;  %v329_v26 = vld [vmem:[#allocation7 + $0x18] sm:$0xff] }
  0x5a   :  { %590 = vmatprep.mubr.msk.f32.mxu0 %vm778_vm0, %v779_v1  ;;  %643 = vmatpush3.bf16.msra.mxu0 %v642_v24  ;;  %v645_v27 = vpack.c.bf16 %v329_v26, %v328_v25 }
  0x5b   :  { %644 = vmatprep.subr.bf16.mxu0 %v777_v0 }
  0x5c   :  { %640 = vmatpush3.bf16.msra.mxu1 %v639_v50 }
  0x5e   :  { %646 = vmatpush3.bf16.msra.mxu0 %v645_v27 }
  0x5f   :  { %647 = vmatprep.subr.bf16.mxu0 %v777_v0 }
  0x62   :  { %649 = vmatpush3.bf16.msra.mxu0 %v648_v30 }
  0x63   :  { %650 = vmatprep.subr.bf16.mxu0 %v777_v0 }
  0x66   :  { %652 = vmatpush3.bf16.msra.mxu0 %v651_v33 }
  0x67   :  { %653 = vmatprep.subr.bf16.mxu0 %v777_v0 }
  0x6a   :  { %655 = vmatpush3.bf16.msra.mxu0 %v654_v36 }
  0x6b   :  { %656 = vmatprep.subr.bf16.mxu0 %v777_v0 }
  0x6e   :  { %658 = vmatpush3.bf16.msra.mxu0 %v657_v39 }
  0x6f   :  { %659 = vmatprep.subr.bf16.mxu0 %v777_v0 }
  0x72   :  { %661 = vmatpush3.bf16.msra.mxu0 %v660_v42 }
  0x73   :  { %662 = vmatprep.subr.bf16.mxu0 %v777_v0 }
  0x76   :  { %664 = vmatpush3.bf16.msra.mxu0 %v663_v45 }
 0x12c   :  { %v157_v51 = vpop.f32.mrb[0].mxu0 }
 0x12d   :  { %v161_v52 = vrot.slane %v157_v51, 4  ;;  %v169_v53 = vmul.f32 %v157_v51, %v157_v51  ;;  %v522_v54 = vpop.f32.mrb[1].mxu0 }
 0x12f   :  { %v162_v55 = vadd.f32 %v161_v52, %v157_v51  ;;  %v170_v56 = vrot.slane %v169_v53, 4 }
 0x131   :  { %v163_v57 = vrot.slane %v162_v55, 2  ;;  %v171_v58 = vadd.f32 %v170_v56, %v169_v53 }
 0x133   :  { %v164_v59 = vadd.f32 %v163_v57, %v162_v55  ;;  %v172_v60 = vrot.slane %v171_v58, 2 }
 0x135   :  { %v165_v61 = vrot.slane %v164_v59, 1  ;;  %v173_v62 = vadd.f32 %v172_v60, %v171_v58 }
 0x137   :  { %v166_v63 = vadd.f32 %v165_v61, %v164_v59  ;;  %v174_v1 = vrot.slane %v173_v62, 1 }
 0x139   :  { %v168_v2 = vmul.f32 0.125, %v166_v63  ;;  %v175_v3 = vadd.f32 %v174_v1, %v173_v62 }
 0x13b   :  { %v176_v4 = vmul.f32 0.125, %v175_v3  ;;  %v177_v5 = vmul.f32 %v168_v2, %v168_v2 }
 0x13d   :  { %v178_v6 = vsub.f32 %v176_v4, %v177_v5  ;;  %v308_v5 = vld [vmem:[%s952_s6] sm:$0x1] }
 0x13f   :  { %v180_v7 = vadd.f32 1e-05, %v178_v6 }
 0x141   :  { %674 = vrsqrt.f32 %v180_v7 }
 0x14b   :  { %v675_v12 = vpop.eup %674 }
 0x14c   :  { %v182_v13 = vmul.f32 %v675_v12, %v179_v10 }
 0x14e   :  { %v190_v15 = vrot.slane %v182_v13, %v909_v11  ;;  %v184_v16 = vmul.f32 %v182_v13, %v168_v2  ;;  %v304_v2 = vld [vmem:[%s951_s5] sm:$0x1]  ;;  %s780_s5 = smov [#allocation8]  }
 0x14f   :  { %s426_s13 = sshll.u32 %s780_s5, 4  ;;  %s427_s13 = int_to_ptr.vmem [resolvable:$true] %s426_s13 }
 0x150   :  { %v185_v17 = vsub.f32 %v183_v14, %v184_v16  ;;  %v192_v18 = vmul.f32 %v190_v15, %v157_v51  ;;  %v436_v14 = vld [vmem:[%s954_s8] ss:$0 sm:$0xff]  ;;  %s744_s6 = scalar_lea.vmem %s427_s13, 128  ;;  %p749_p11 = scmp.lt.s32.totalorder %s427_s13, %s427_s13 }
 0x151   :  { %p745_p10 = scmp.ne.s32.totalorder %s427_s13, %s744_s6  ;;  %p750_p12 = scmp.lt.s32.totalorder %s744_s6, %s744_s6 }
 0x152   :  { %v197_v19 = vrot.slane %v185_v17, %v909_v11 }
 0x153   :  { %p751_p13 = por %p750_p12, %p749_p11 }
 0x154   :  { %v199_v20 = vadd.f32 %v197_v19, %v192_v18 }
 0x155   :  { %p752_p0 = pnand %p751_p13, %p745_p10 }
 0x156   :  { %v200_v21 = vmax.f32 %v199_v20, 0.0 }
 0x158   :  { %556 = vmatmul.mubr.f32.vlgmr.msra.gmra.mrb[0].mxu1 %v200_v21 }
 0x22b   :  { %v283_v46 = vpop.f32.mrb[0].mxu1 }
 0x22c   :  { %v287_v47 = vrot.slane %v283_v46, 4  ;;  %v294_v48 = vmul.f32 %v283_v46, %v283_v46  ;;  %v557_v49 = vpop.f32.mrb[1].mxu1 }
 0x22e   :  { %v288_v50 = vadd.f32 %v287_v47, %v283_v46  ;;  %v295_v51 = vrot.slane %v294_v48, 4 }
 0x230   :  { %v289_v52 = vrot.slane %v288_v50, 2  ;;  %v296_v53 = vadd.f32 %v295_v51, %v294_v48 }
 0x232   :  { %v290_v54 = vadd.f32 %v289_v52, %v288_v50  ;;  %v297_v55 = vrot.slane %v296_v53, 2 }
 0x234   :  { %v291_v56 = vrot.slane %v290_v54, 1  ;;  %v298_v57 = vadd.f32 %v297_v55, %v296_v53 }
 0x236   :  { %v292_v58 = vadd.f32 %v291_v56, %v290_v54  ;;  %v299_v59 = vrot.slane %v298_v57, 1 }
 0x238   :  { %v293_v60 = vmul.f32 0.125, %v292_v58  ;;  %v300_v0 = vadd.f32 %v299_v59, %v298_v57 }
 0x23a   :  { %v301_v61 = vmul.f32 0.125, %v300_v0  ;;  %v302_v62 = vmul.f32 %v293_v60, %v293_v60 }
 0x23c   :  { %v303_v63 = vsub.f32 %v301_v61, %v302_v62 }
 0x23e   :  { %v305_v1 = vadd.f32 1e-05, %v303_v63 }
 0x240   :  { %676 = vrsqrt.f32 %v305_v1 }
 0x24a   :  { %v677_v3 = vpop.eup %676 }
 0x24b   :  { %v307_v4 = vmul.f32 %v677_v3, %v304_v2 }
 0x24d   :  { %v309_v6 = vmul.f32 %v307_v4, %v293_v60  ;;  %v315_v7 = vrot.slane %v307_v4, %v909_v11 }
 0x24f   :  { %v310_v8 = vsub.f32 %v308_v5, %v309_v6  ;;  %v317_v9 = vmul.f32 %v315_v7, %v283_v46 }
 0x251   :  { %v322_v10 = vrot.slane %v310_v8, %v909_v11 }
 0x253   :  { %v324_v12 = vadd.f32 %v322_v10, %v317_v9 }
 0x255   :  { %v325_v13 = vmax.f32 %v324_v12, 0.0 }
 0x257   :  { %591 = vmatmul.mubr.f32.vlgmr.msra.gmra.mrb[2].mxu0 %v325_v13 }
 0x32a   :  { %v415_v15 = vpop.f32.mrb[2].mxu0 }
 0x32b   :  { %v416_v16 = vadd.f32 %v436_v14, %v415_v15  ;;  %v592_v17 = vpop.f32.mrb[3].mxu0 }
 0x32d   :  { %419 = vst [vmem:[#allocation8] sm:$0xff] %v416_v16 }
 0x32e   :  { %755 = shalt.err (!%p752_p0)
}
 0x32f   :  { %s756_s14 = scalar_lea.hbm %s955_s9, 128 }
 0x330   :  { %p757_p1 = scmp.ne.s32.totalorder %s955_s9, %s756_s14  ;;  %p760_p2 = scmp.lt.u32.totalorder %s756_s14, %s955_s9 }
 0x332   :  { %p762_p3 = pnand %p760_p2, %p757_p1 }
 0x334   :  { %765 = shalt.err (!%p762_p3)
}
 0x335   :  { %429 = dma.vmem_to_hbm [thread:$0]  %s427_s13, 128, %s955_s9, [#allocation4]  }
 0x336   :  { %770 = dma.done.wait [#allocation4], 128  }
 0x337   :  { %771 = vsyncadd [#allocation4], 4294967168 }
 0x338   :  { %433 = vsyncpa [#allocation3], 1 }
 0x339   :  { %434 = vsyncpa [#allocation6], 1 }
 0x33a   :  { %435 = vsyncpa [#allocation4], 1 }

</bundles_post_ra>
